<compile_context>
chip_gen: v5e
topology: v5e:2x2
jax: 0.10.0
libtpu: 0.0.40
codegen_flags: <defaults>
</compile_context>

<pallas_src>
import jax
import jax.numpy as jnp
from jax.experimental import pallas as pl
from jax.experimental.pallas import tpu as pltpu


# ---------------------------------------------------------------- activations
def _apply_activation(h, name):
    name = name.lower()
    if name == "relu":
        return jnp.maximum(h, 0.0)
    if name == "silu":
        return h * jax.nn.sigmoid(h)
    if name == "gelu":
        return jax.nn.gelu(h, approximate=False)   # matches nn.GELU() default
    if name == "selu":
        return jax.nn.selu(h)
    raise ValueError(f"Unsupported activation in kernel: {name}")


# -------------------------------------------------------------------- kernel
def _make_glu_kernel(activation: str, has_bias: bool, tk: int, use_scratch: bool):
    def kernel(*refs):
        if has_bias:
            if use_scratch:
                x_ref, w13_ref, w2_ref, b13_ref, b2_ref, o_ref, acc_ref = refs
            else:
                x_ref, w13_ref, w2_ref, b13_ref, b2_ref, o_ref = refs
                acc_ref = o_ref          # f32 output block doubles as accumulator
        else:
            if use_scratch:
                x_ref, w13_ref, w2_ref, o_ref, acc_ref = refs
            else:
                x_ref, w13_ref, w2_ref, o_ref = refs
                acc_ref = o_ref
            b13_ref = b2_ref = None

        k = pl.program_id(1)

        @pl.when(k == 0)
        def _():
            acc_ref[...] = jnp.zeros_like(acc_ref)

        # One fused first-stage matmul for both gates: (tm, Ep) @ (Ep, 2*tk).
        # Native dtype on the MXU, f32 accumulation.
        h13 = jnp.dot(x_ref[...], w13_ref[...],
                      preferred_element_type=jnp.float32)
        if has_bias:
            # b13 is resident; row k holds [b1_tile_k | b3_tile_k] of width 2*tk.
            h13 = h13 + b13_ref[k].astype(jnp.float32)

        h1 = h13[:, :tk]
        h3 = h13[:, tk:]
        h = _apply_activation(h1, activation) * h3        # (tm, tk) f32

        # Second stage: cast gate to the weight dtype (bf16 MXU path when the
        # params are bf16), accumulate in f32.
        acc_ref[...] += jnp.dot(h.astype(w2_ref.dtype), w2_ref[...],
                                preferred_element_type=jnp.float32)

        if has_bias or use_scratch:
            @pl.when(k == pl.num_programs(1) - 1)
            def _():
                out = acc_ref[...]
                if has_bias:
                    out = out + b2_ref[...].astype(jnp.float32)
                o_ref[...] = out.astype(o_ref.dtype)

    return kernel


# ------------------------------------------------------------------- helpers
def _round_up(a, b):
    return (a + b - 1) // b * b


def _pick_hidden_tile(H, max_tk):
    """Largest multiple of 128 <= max_tk dividing H (H is a multiple of 128)."""
    if H <= max_tk:
        return H
    start = (min(max_tk, H) // 128) * 128
    for tk in range(start, 127, -128):
        if H % tk == 0:
            return tk
    return 128


def _tpu_budget():
    """Returns (vmem_limit_bytes, two_tensorcores_per_chip) for this generation."""
    vmem_cap = 128 * 1024 * 1024
    two_cores = False
    try:
        kind = jax.devices()[0].device_kind.lower()
        if "v7" in kind or "7x" in kind:
            vmem_cap = 64 * 1024 * 1024     # v7x: 64 MiB per TensorCore
            two_cores = True
    except Exception:
        pass
    try:
        info = pltpu.get_tpu_info()
        cap = getattr(info, "vmem_capacity_bytes", None)
        if cap:
            vmem_cap = int(cap)
    except Exception:
        pass
    return int(vmem_cap * 3 // 4), two_cores    # leave headroom for compiler scratch


# --------------------------------------------------------- one-time param prep
def glu_prepare_params(w1, b1, w3, b3, w2, b2, *, block_h=None):
    """Hoisted parameter prep: transpose, pad, and fuse weights once (not per call).

    w1, w3 : (H, E)  nn.Linear layout;  w2 : (E, H);  b1, b3 : (H,);  b2 : (E,).
    """
    H, E = w1.shape
    assert w3.shape == (H, E) and w2.shape == (E, H)
    has_bias = b1 is not None

    Ep = max(_round_up(E, 128), 128)   # lane-dense output / contraction width
    Hp = max(_round_up(H, 128), 128)

    vmem_budget, _ = _tpu_budget()
    max_tk = 512 if vmem_budget >= (96 << 20) else 256
    if block_h is not None:
        if block_h % 128 != 0 or Hp % block_h != 0:
            raise ValueError(
                f"block_h={block_h} must be a multiple of 128 that divides padded H={Hp}")
        tk = block_h
    else:
        tk = _pick_hidden_tile(Hp, max_tk)
    nk = Hp // tk

    dt = w1.dtype
    w1t = jnp.pad(jnp.transpose(w1), ((0, Ep - E), (0, Hp - H)))     # (Ep, Hp)
    w3t = jnp.pad(jnp.transpose(w3), ((0, Ep - E), (0, Hp - H)))
    # Interleave per hidden tile: [w1_t0 | w3_t0 | w1_t1 | w3_t1 | ...] -> (Ep, 2*Hp)
    w13 = jnp.stack([w1t.reshape(Ep, nk, tk), w3t.reshape(Ep, nk, tk)], axis=2)
    w13 = w13.reshape(Ep, 2 * Hp).astype(dt)

    w2t = jnp.pad(jnp.transpose(w2), ((0, Hp - H), (0, Ep - E))).astype(w2.dtype)  # (Hp, Ep)

    if has_bias:
        b1p = jnp.pad(b1.reshape(-1), (0, Hp - H))
        b3p = jnp.pad(b3.reshape(-1), (0, Hp - H))
        # (nk, 1, 2*tk): row k = [b1_tile_k | b3_tile_k]; resident in VMEM.
        b13 = jnp.stack([b1p.reshape(nk, tk), b3p.reshape(nk, tk)],
                        axis=1).reshape(nk, 1, 2 * tk)
        b2p = jnp.pad(b2.reshape(-1), (0, Ep - E)).reshape(1, Ep)
    else:
        b13 = b2p = None

    return dict(w13=w13, w2t=w2t, b13=b13, b2=b2p,
                E=E, Ep=Ep, H=H, Hp=Hp, tk=tk, nk=nk, has_bias=has_bias)


# ------------------------------------------------------------------- forward
def glu_forward(x, params, *, activation="silu", block_m=None):
    """Matches GLU.forward in eval mode (dropout == identity)."""
    E, Ep, Hp, tk, nk = (params["E"], params["Ep"], params["Hp"],
                         params["tk"], params["nk"])
    has_bias = params["has_bias"]
    w13, w2t, b13, b2 = params["w13"], params["w2t"], params["b13"], params["b2"]

    orig_shape = x.shape
    assert orig_shape[-1] == E
    M = 1
    for s in orig_shape[:-1]:
        M *= int(s)

    x2 = x.reshape(M, E)
    if Ep != E:
        x2 = jnp.pad(x2, ((0, 0), (0, Ep - E)))

    vmem_budget, two_cores = _tpu_budget()
    itemsize = jnp.dtype(x.dtype).itemsize
    out_dtype = x.dtype
    out_itemsize = jnp.dtype(out_dtype).itemsize
    use_scratch = out_dtype != jnp.float32   # f32 output accumulates in place

    # --- row tile: sublane-aligned, large enough to amortize per-step overhead,
    #     but capped so 2-TC chips get >= 2 row tiles on the "parallel" axis.
    tm_cap = _round_up(max(M, 1), 8)
    if two_cores and M > 8:
        tm_cap = min(tm_cap, _round_up(pl.cdiv(M, 2), 8))
    tm_target = block_m if block_m is not None else (
        512 if vmem_budget >= (96 << 20) else 256)
    tm = min(_round_up(max(tm_target, 8), 8), tm_cap)

    def vmem_est(tm_):
        wset = (tm_ * Ep * itemsize            # x tile
                + Ep * 2 * tk * itemsize       # fused w1|w3 tile
                + tk * Ep * itemsize)          # w2 tile
        out_bytes = 2 * tm_ * Ep * out_itemsize
        acc_bytes = tm_ * Ep * 4 if use_scratch else 0
        bias_bytes = (2 * Hp + Ep) * 4 if has_bias else 0
        return 2 * wset + out_bytes + acc_bytes + bias_bytes

    while vmem_est(tm) > vmem_budget and tm > 8:
        tm = max(8, _round_up(tm // 2, 8))

    Mp = _round_up(M, tm)
    if Mp != M:
        x2 = jnp.pad(x2, ((0, Mp - M), (0, 0)))

    grid = (Mp // tm, Hp // tk)

    in_specs = [
        pl.BlockSpec((tm, Ep), lambda i, k: (i, 0)),          # x (resident over k)
        pl.BlockSpec((Ep, 2 * tk), lambda i, k: (0, k)),      # fused w1^T|w3^T
        pl.BlockSpec((tk, Ep), lambda i, k: (k, 0)),          # w2^T
    ]
    operands = [x2, w13, w2t]
    if has_bias:
        in_specs += [
            pl.BlockSpec((nk, 1, 2 * tk), lambda i, k: (0, 0, 0)),  # b1|b3, resident
            pl.BlockSpec((1, Ep), lambda i, k: (0, 0)),             # b2, resident
        ]
        operands += [b13, b2]

    scratch_shapes = [pltpu.VMEM((tm, Ep), jnp.float32)] if use_scratch else []

    out = pl.pallas_call(
        _make_glu_kernel(activation, has_bias, tk, use_scratch),
        out_shape=jax.ShapeDtypeStruct((Mp, Ep), out_dtype),
        grid_spec=pltpu.PrefetchScalarGridSpec(
            num_scalar_prefetch=0,
            grid=grid,
            in_specs=in_specs,
            out_specs=pl.BlockSpec((tm, Ep), lambda i, k: (i, 0)),
            scratch_shapes=scratch_shapes,
        ),
        compiler_params=pltpu.CompilerParams(
            dimension_semantics=("parallel", "arbitrary"),
            vmem_limit_bytes=vmem_budget,
        ),
    )(*operands)

    out = out[:M, :E]
    return out.reshape(orig_shape)


# ---------------------------------------------------------------------- demo
if __name__ == "__main__":
    key = jax.random.PRNGKey(0)

    # config: n_embd=32, bias=True, dropout=0.0 (eval), activation='silu'
    B, T, E = 2, 8, 32
    hidden_dim = 4 * int(2 * E / 3)
    H = 256 * ((hidden_dim + 255) // 256)          # -> 256

    ks = jax.random.split(key, 8)
    x = jax.random.normal(ks[0], (B, T, E), dtype=jnp.float32)
    w1 = jax.random.normal(ks[1], (H, E), dtype=jnp.float32) / jnp.sqrt(E)
    b1 = 0.01 * jax.random.normal(ks[2], (H,), dtype=jnp.float32)
    w3 = jax.random.normal(ks[3], (H, E), dtype=jnp.float32) / jnp.sqrt(E)
    b3 = 0.01 * jax.random.normal(ks[4], (H,), dtype=jnp.float32)
    w2 = jax.random.normal(ks[5], (E, H), dtype=jnp.float32) / jnp.sqrt(H)
    b2 = 0.01 * jax.random.normal(ks[6], (E,), dtype=jnp.float32)

    # One-time parameter prep (transpose + fuse + pad), hoisted out of forward.
    params = glu_prepare_params(w1, b1, w3, b3, w2, b2)

    y = glu_forward(x, params, activation="silu")
    y = jax.block_until_ready(y)

    # Pure-JAX f32 reference (dropout p=0 -> identity).
    x2 = x.reshape(-1, E)
    h1 = jnp.dot(x2, w1.T, precision=jax.lax.Precision.HIGHEST) + b1
    h3 = jnp.dot(x2, w3.T, precision=jax.lax.Precision.HIGHEST) + b3
    hid = (h1 * jax.nn.sigmoid(h1)) * h3
    ref = (jnp.dot(hid, w2.T, precision=jax.lax.Precision.HIGHEST) + b2).reshape(B, T, E)

    err = float(jnp.max(jnp.abs(y - ref)))
    # The kernel runs the MXU at native/default precision (per perf review),
    # so the tolerance vs. the f32/HIGHEST reference is loosened accordingly.
    assert jnp.allclose(y, ref, atol=3e-2, rtol=3e-2), err

    print("KERNEL_OK")
</pallas_src>

<mosaic_0001>
module attributes {stable_mosaic.version = 11 : i64} {
  func.func @kernel(%arg0: i32, %arg1: i32, %arg2: memref<16x128xf32, #tpu.memory_space<vmem>>, %arg3: memref<128x512xf32, #tpu.memory_space<vmem>>, %arg4: memref<256x128xf32, #tpu.memory_space<vmem>>, %arg5: memref<1x1x512xf32, #tpu.memory_space<vmem>>, %arg6: memref<1x128xf32, #tpu.memory_space<vmem>>, %arg7: memref<16x128xf32, #tpu.memory_space<vmem>>) attributes {dimension_semantics = [#tpu.dimension_semantics<parallel>, #tpu.dimension_semantics<arbitrary>], iteration_bounds = array<i64: 1, 1>, scalar_prefetch = 0 : i64, scratch_operands = 0 : i64, tpu.core_type = #tpu.core_type<tc>, window_params = [{transform_indices = @transform_0, window_bounds = array<i64: 16, 128>}, {transform_indices = @transform_1, window_bounds = array<i64: 128, 512>}, {transform_indices = @transform_2, window_bounds = array<i64: 256, 128>}, {pipeline_mode = #tpu.pipeline_mode<synchronous>, transform_indices = @transform_3, window_bounds = array<i64: 1, 1, 512>}, {pipeline_mode = #tpu.pipeline_mode<synchronous>, transform_indices = @transform_4, window_bounds = array<i64: 1, 128>}, {transform_indices = @transform_5, window_bounds = array<i64: 16, 128>}]} {
    %c0_i32 = arith.constant 0 : i32
    %0 = arith.cmpi eq, %arg1, %c0_i32 : i32
    %1 = arith.extui %0 : i1 to i32
    %c0_i32_0 = arith.constant 0 : i32
    %2 = arith.cmpi ne, %1, %c0_i32_0 : i32
    scf.if %2 {
      %cst_16 = arith.constant 0.000000e+00 : f32
      %28 = vector.broadcast %cst_16 : f32 to vector<16x128xf32>
      %c0_17 = arith.constant 0 : index
      %c0_18 = arith.constant 0 : index
      %29 = vector.load %arg7[%c0_17, %c0_18] : memref<16x128xf32, #tpu.memory_space<vmem>>, vector<16x128xf32>
      tpu.vector_store %arg7[%c0_17, %c0_18], %28 {strides = array<i32>} : memref<16x128xf32, #tpu.memory_space<vmem>>, vector<16x128xf32>,
    } else {
    }
    %c0 = arith.constant 0 : index
    %c0_1 = arith.constant 0 : index
    %3 = vector.load %arg2[%c0, %c0_1] : memref<16x128xf32, #tpu.memory_space<vmem>>, vector<16x128xf32>
    %c0_2 = arith.constant 0 : index
    %c0_3 = arith.constant 0 : index
    %4 = vector.load %arg3[%c0_2, %c0_3] : memref<128x512xf32, #tpu.memory_space<vmem>>, vector<128x512xf32>
    %cst = arith.constant dense<0.000000e+00> : vector<16x512xf32>
    %5 = tpu.matmul %3, %4, %cst {dimension_numbers = #tpu.dot_dimension_numbers<[1], [0], [0], [1], [0, 0, 1, 1], [], []>} : vector<16x128xf32>, vector<128x512xf32>, vector<16x512xf32> -> vector<16x512xf32>
    %6 = arith.index_cast %arg1 : i32 to index
    %c0_4 = arith.constant 0 : index
    %c0_5 = arith.constant 0 : index
    %7 = vector.load %arg5[%6, %c0_4, %c0_5] : memref<1x1x512xf32, #tpu.memory_space<vmem>>, vector<1x1x512xf32>
    %8 = vector.shape_cast %7 : vector<1x1x512xf32> to vector<1x512xf32>
    %9 = vector.broadcast %8 : vector<1x512xf32> to vector<16x512xf32>
    %10 = arith.addf %5, %9 : vector<16x512xf32>
    %11 = vector.extract_strided_slice %10 {offsets = [0, 0], sizes = [16, 256], strides = [1, 1]} : vector<16x512xf32> to vector<16x256xf32>
    %12 = vector.extract_strided_slice %10 {offsets = [0, 256], sizes = [16, 256], strides = [1, 1]} : vector<16x512xf32> to vector<16x256xf32>
    %13 = arith.negf %11 : vector<16x256xf32>
    %14 = math.exp %13 : vector<16x256xf32>
    %cst_6 = arith.constant 1.000000e+00 : f32
    %15 = vector.broadcast %cst_6 : f32 to vector<16x256xf32>
    %16 = arith.addf %15, %14 : vector<16x256xf32>
    %17 = arith.divf %15, %16 : vector<16x256xf32>
    %18 = arith.mulf %11, %17 : vector<16x256xf32>
    %19 = arith.mulf %18, %12 : vector<16x256xf32>
    %c0_7 = arith.constant 0 : index
    %c0_8 = arith.constant 0 : index
    %20 = vector.load %arg7[%c0_7, %c0_8] : memref<16x128xf32, #tpu.memory_space<vmem>>, vector<16x128xf32>
    %c0_9 = arith.constant 0 : index
    %c0_10 = arith.constant 0 : index
    %21 = vector.load %arg4[%c0_9, %c0_10] : memref<256x128xf32, #tpu.memory_space<vmem>>, vector<256x128xf32>
    %cst_11 = arith.constant dense<0.000000e+00> : vector<16x128xf32>
    %22 = tpu.matmul %19, %21, %cst_11 {dimension_numbers = #tpu.dot_dimension_numbers<[1], [0], [0], [1], [0, 0, 1, 1], [], []>} : vector<16x256xf32>, vector<256x128xf32>, vector<16x128xf32> -> vector<16x128xf32>
    %23 = arith.addf %20, %22 : vector<16x128xf32>
    %c0_12 = arith.constant 0 : index
    %c0_13 = arith.constant 0 : index
    %24 = vector.load %arg7[%c0_12, %c0_13] : memref<16x128xf32, #tpu.memory_space<vmem>>, vector<16x128xf32>
    tpu.vector_store %arg7[%c0_12, %c0_13], %23 {strides = array<i32>} : memref<16x128xf32, #tpu.memory_space<vmem>>, vector<16x128xf32>,
    %c0_i32_14 = arith.constant 0 : i32
    %25 = arith.cmpi eq, %arg1, %c0_i32_14 : i32
    %26 = arith.extui %25 : i1 to i32
    %c0_i32_15 = arith.constant 0 : i32
    %27 = arith.cmpi ne, %26, %c0_i32_15 : i32
    scf.if %27 {
      %c0_16 = arith.constant 0 : index
      %c0_17 = arith.constant 0 : index
      %28 = vector.load %arg7[%c0_16, %c0_17] : memref<16x128xf32, #tpu.memory_space<vmem>>, vector<16x128xf32>
      %c0_18 = arith.constant 0 : index
      %c0_19 = arith.constant 0 : index
      %29 = vector.load %arg6[%c0_18, %c0_19] : memref<1x128xf32, #tpu.memory_space<vmem>>, vector<1x128xf32>
      %30 = vector.broadcast %29 : vector<1x128xf32> to vector<16x128xf32>
      %31 = arith.addf %28, %30 : vector<16x128xf32>
      %c0_20 = arith.constant 0 : index
      %c0_21 = arith.constant 0 : index
      %32 = vector.load %arg7[%c0_20, %c0_21] : memref<16x128xf32, #tpu.memory_space<vmem>>, vector<16x128xf32>
      tpu.vector_store %arg7[%c0_20, %c0_21], %31 {strides = array<i32>} : memref<16x128xf32, #tpu.memory_space<vmem>>, vector<16x128xf32>,
    } else {
    }
    return
  }
  func.func @transform_0(%arg0: i32, %arg1: i32) -> (i32, i32) {
    %c0_i32 = arith.constant 0 : i32
    %c0_i32_0 = arith.constant 0 : i32
    return %arg0, %c0_i32 : i32, i32
  }
  func.func @transform_1(%arg0: i32, %arg1: i32) -> (i32, i32) {
    %c0_i32 = arith.constant 0 : i32
    %c0_i32_0 = arith.constant 0 : i32
    return %c0_i32, %arg1 : i32, i32
  }
  func.func @transform_2(%arg0: i32, %arg1: i32) -> (i32, i32) {
    %c0_i32 = arith.constant 0 : i32
    %c0_i32_0 = arith.constant 0 : i32
    return %arg1, %c0_i32 : i32, i32
  }
  func.func @transform_3(%arg0: i32, %arg1: i32) -> (i32, i32, i32) {
    %c0_i32 = arith.constant 0 : i32
    %c0_i32_0 = arith.constant 0 : i32
    %c0_i32_1 = arith.constant 0 : i32
    %c0_i32_2 = arith.constant 0 : i32
    return %c0_i32, %c0_i32_0, %c0_i32_1 : i32, i32, i32
  }
  func.func @transform_4(%arg0: i32, %arg1: i32) -> (i32, i32) {
    %c0_i32 = arith.constant 0 : i32
    %c0_i32_0 = arith.constant 0 : i32
    %c0_i32_1 = arith.constant 0 : i32
    return %c0_i32, %c0_i32_0 : i32, i32
  }
  func.func @transform_5(%arg0: i32, %arg1: i32) -> (i32, i32) {
    %c0_i32 = arith.constant 0 : i32
    %c0_i32_0 = arith.constant 0 : i32
    return %arg0, %c0_i32 : i32, i32
  }
}

</mosaic_0001>

<bundles_post_ra>
// kernel: tpu_custom_call.1
= control target key start
LH: loop header
LB: loop body
LE: loop exit
PB: predicated region body
PF: predicated region fallthrough
CT: control target
= control target key end

     0   :  { %10 = vsyncpa [#allocation3], 0  ;;  %s753_s0 = inlined_call_operand.hbm [shape: f32[16,128], index: 0, kind: input, shape index: {}]   ;;  %s754_s1 = inlined_call_operand.hbm [shape: f32[128,512], index: 1, kind: input, shape index: {}]   ;;  %s755_s2 = inlined_call_operand.hbm [shape: f32[256,128], index: 2, kind: input, shape index: {}]   ;;  %s756_s3 = inlined_call_operand.hbm [shape: f32[1,1,512], index: 3, kind: input, shape index: {}]   ;;  %s757_s4 = inlined_call_operand.vmem [shape: f32[1,128], index: 4, kind: input, shape index: {}]   ;;  %s758_s5 = inlined_call_operand.hbm [shape: f32[16,128], index: 5, kind: output, shape index: {}]  }
   0x1   :  { %11 = vsyncpa [#allocation6], 0 }
   0x2   :  { %12 = vsyncpa [#allocation9], 0  ;;  %s31_s20 = sshll.u32 %s754_s1, 4  ;;  %s32_s20 = int_to_ptr.hbm [resolvable:$true] %s31_s20 }
   0x3   :  { %13 = vsyncpa [#allocation4], 0  ;;  %s651_s21 = smov [#allocation5]   ;;  %s18_s25 = sshll.u32 %s753_s0, 4  ;;  %s19_s25 = int_to_ptr.hbm [resolvable:$true] %s18_s25 }
   0x4   :  { %s33_s22 = sshll.u32 %s651_s21, 4  ;;  %s652_s26 = smov 512   ;;  %s34_s22 = int_to_ptr.vmem [resolvable:$true] %s33_s22 }
   0x5   :  { %s653_s27 = smov 32   ;;  %s654_s28 = smov [#allocation2]  }
   0x6   :  { %39 = dma.hbm_to_vmem [thread:$0]  %s32_s20, 8192, %s34_s22, [#allocation6], %s652_s26, %s652_s26, %s653_s27  }
   0x7   :  { %s20_s29 = sshll.u32 %s654_s28, 4  ;;  %s655_s30 = smov 128   ;;  %s21_s29 = int_to_ptr.vmem [resolvable:$true] %s20_s29 }
   0x8   :  { %s656_s6 = smov 8   ;;  %s44_s8 = sshll.u32 %s755_s2, 4  ;;  %s45_s8 = int_to_ptr.hbm [resolvable:$true] %s44_s8 }
   0x9   :  { %26 = dma.hbm_to_vmem [thread:$0]  %s19_s25, 256, %s21_s29, [#allocation3], %s655_s30, %s655_s30, %s656_s6  }
   0xa   :  { %s657_s9 = smov [#allocation7]   ;;  %s58_s12 = sshll.u32 %s756_s3, 4  ;;  %s59_s12 = int_to_ptr.hbm [resolvable:$true] %s58_s12 }
   0xb   :  { %s46_s0 = sshll.u32 %s657_s9, 4  ;;  %s658_s13 = smov [#allocation8]   ;;  %s47_s0 = int_to_ptr.vmem [resolvable:$true] %s46_s0 }
   0xc   :  { %52 = dma.hbm_to_vmem [thread:$0]  %s45_s8, 4096, %s47_s0, [#allocation6], %s655_s30, %s655_s30, %s656_s6  }
   0xd   :  { %s60_s14 = sshll.u32 %s658_s13, 4  ;;  %s61_s14 = int_to_ptr.vmem [resolvable:$true] %s60_s14 }
   0xe   :  { %63 = dma.hbm_to_vmem [thread:$0]  %s59_s12, 64, %s61_s14, [#allocation9]  }
   0xf   :  { %643 = dma.done.wait [#allocation3], 256  }
  0x10   :  { %644 = vsyncadd [#allocation3], 4294967040 }
  0x11   :  { %645 = dma.done.wait [#allocation6], 12288  }
  0x12   :  { %646 = vsyncadd [#allocation6], 4294955008 }
  0x13   :  { %647 = dma.done.wait [#allocation9], 64  }
  0x14   :  { %648 = vsyncadd [#allocation9], 4294967232  ;;  %v150_v0 = vld [vmem:[#allocation5 + $0x1e0] sm:$0xff]  ;;  %v151_v1 = vld [vmem:[#allocation5 + $0x1e8] sm:$0xff]  ;;  %s659_s15 = smov [#allocation10]   ;;  %s445_s19 = sshll.u32 %s758_s5, 4  ;;  %s446_s19 = int_to_ptr.hbm [resolvable:$true] %s445_s19 }
  0x15   :  { %v146_v2 = vld [vmem:[#allocation5 + $0x1c0] sm:$0xff]  ;;  %166 = vmatpush.msra.mxu0 %v150_v0  ;;  %189 = vmatpush.msra.mxu1 %v151_v1  ;;  %v147_v3 = vld [vmem:[#allocation5 + $0x1c8] sm:$0xff]  ;;  %v152_v12 = vld [vmem:[#allocation5 + $0x1f0] sm:$0xff]  ;;  %s443_s16 = sshll.u32 %s659_s15, 4  ;;  %s444_s16 = int_to_ptr.vmem [resolvable:$true] %s443_s16 }
  0x16   :  { %v142_v4 = vld [vmem:[#allocation5 + $0x1a0] sm:$0xff]  ;;  %v143_v5 = vld [vmem:[#allocation5 + $0x1a8] sm:$0xff]  ;;  %v153_v14 = vld [vmem:[#allocation5 + $0x1f8] sm:$0xff]  ;;  %212 = vmatpush.msra.mxu2 %v152_v12 }
  0x17   :  { %167 = vmatpush.msra.mxu0 %v146_v2  ;;  %190 = vmatpush.msra.mxu1 %v147_v3  ;;  %v138_v6 = vld [vmem:[#allocation5 + $0x180] sm:$0xff]  ;;  %v139_v7 = vld [vmem:[#allocation5 + $0x188] sm:$0xff]  ;;  %v148_v16 = vld [vmem:[#allocation5 + $0x1d0] sm:$0xff] }
  0x18   :  { %v134_v8 = vld [vmem:[#allocation5 + $0x160] sm:$0xff]  ;;  %v135_v9 = vld [vmem:[#allocation5 + $0x168] sm:$0xff]  ;;  %235 = vmatpush.msra.mxu3 %v153_v14  ;;  %v149_v17 = vld [vmem:[#allocation5 + $0x1d8] sm:$0xff]  ;;  %213 = vmatpush.msra.mxu2 %v148_v16 }
  0x19   :  { %168 = vmatpush.msra.mxu0 %v142_v4  ;;  %191 = vmatpush.msra.mxu1 %v143_v5  ;;  %v130_v10 = vld [vmem:[#allocation5 + $0x140] sm:$0xff]  ;;  %v131_v11 = vld [vmem:[#allocation5 + $0x148] sm:$0xff]  ;;  %v144_v18 = vld [vmem:[#allocation5 + $0x1b0] sm:$0xff] }
  0x1a   :  { %v126_v13 = vld [vmem:[#allocation5 + $0x120] sm:$0xff]  ;;  %v127_v15 = vld [vmem:[#allocation5 + $0x128] sm:$0xff]  ;;  %v145_v19 = vld [vmem:[#allocation5 + $0x1b8] sm:$0xff]  ;;  %236 = vmatpush.msra.mxu3 %v149_v17  ;;  %214 = vmatpush.msra.mxu2 %v144_v18 }
  0x1b   :  { %169 = vmatpush.msra.mxu0 %v138_v6  ;;  %192 = vmatpush.msra.mxu1 %v139_v7  ;;  %v122_v20 = vld [vmem:[#allocation5 + $0x100] sm:$0xff]  ;;  %v123_v21 = vld [vmem:[#allocation5 + $0x108] sm:$0xff]  ;;  %v140_v22 = vld [vmem:[#allocation5 + $0x190] sm:$0xff] }
  0x1c   :  { %v141_v23 = vld [vmem:[#allocation5 + $0x198] sm:$0xff]  ;;  %v118_v24 = vld [vmem:[#allocation5 + $0xe0] sm:$0xff]  ;;  %v119_v25 = vld [vmem:[#allocation5 + $0xe8] sm:$0xff]  ;;  %237 = vmatpush.msra.mxu3 %v145_v19  ;;  %215 = vmatpush.msra.mxu2 %v140_v22 }
  0x1d   :  { %170 = vmatpush.msra.mxu0 %v134_v8  ;;  %193 = vmatpush.msra.mxu1 %v135_v9  ;;  %v136_v26 = vld [vmem:[#allocation5 + $0x170] sm:$0xff]  ;;  %v137_v27 = vld [vmem:[#allocation5 + $0x178] sm:$0xff]  ;;  %v114_v28 = vld [vmem:[#allocation5 + $0xc0] sm:$0xff] }
  0x1e   :  { %v115_v29 = vld [vmem:[#allocation5 + $0xc8] sm:$0xff]  ;;  %238 = vmatpush.msra.mxu3 %v141_v23  ;;  %v132_v30 = vld [vmem:[#allocation5 + $0x150] sm:$0xff]  ;;  %v133_v31 = vld [vmem:[#allocation5 + $0x158] sm:$0xff]  ;;  %216 = vmatpush.msra.mxu2 %v136_v26 }
  0x1f   :  { %171 = vmatpush.msra.mxu0 %v130_v10  ;;  %194 = vmatpush.msra.mxu1 %v131_v11  ;;  %v110_v32 = vld [vmem:[#allocation5 + $0xa0] sm:$0xff]  ;;  %v111_v33 = vld [vmem:[#allocation5 + $0xa8] sm:$0xff]  ;;  %v128_v34 = vld [vmem:[#allocation5 + $0x130] sm:$0xff] }
  0x20   :  { %239 = vmatpush.msra.mxu3 %v137_v27  ;;  %v129_v35 = vld [vmem:[#allocation5 + $0x138] sm:$0xff]  ;;  %v106_v36 = vld [vmem:[#allocation5 + $0x80] sm:$0xff]  ;;  %v107_v37 = vld [vmem:[#allocation5 + $0x88] sm:$0xff]  ;;  %217 = vmatpush.msra.mxu2 %v132_v30 }
  0x21   :  { %172 = vmatpush.msra.mxu0 %v126_v13  ;;  %195 = vmatpush.msra.mxu1 %v127_v15  ;;  %v124_v38 = vld [vmem:[#allocation5 + $0x110] sm:$0xff]  ;;  %v125_v39 = vld [vmem:[#allocation5 + $0x118] sm:$0xff]  ;;  %v102_v40 = vld [vmem:[#allocation5 + $0x60] sm:$0xff] }
  0x22   :  { %240 = vmatpush.msra.mxu3 %v133_v31  ;;  %v103_v41 = vld [vmem:[#allocation5 + $0x68] sm:$0xff]  ;;  %218 = vmatpush.msra.mxu2 %v128_v34  ;;  %v120_v42 = vld [vmem:[#allocation5 + $0xf0] sm:$0xff]  ;;  %v121_v43 = vld [vmem:[#allocation5 + $0xf8] sm:$0xff] }
  0x23   :  { %173 = vmatpush.msra.mxu0 %v122_v20  ;;  %196 = vmatpush.msra.mxu1 %v123_v21  ;;  %v98_v44 = vld [vmem:[#allocation5 + $0x40] sm:$0xff]  ;;  %v99_v45 = vld [vmem:[#allocation5 + $0x48] sm:$0xff]  ;;  %v116_v46 = vld [vmem:[#allocation5 + $0xd0] sm:$0xff] }
  0x24   :  { %241 = vmatpush.msra.mxu3 %v129_v35  ;;  %219 = vmatpush.msra.mxu2 %v124_v38  ;;  %v117_v47 = vld [vmem:[#allocation5 + $0xd8] sm:$0xff]  ;;  %v94_v48 = vld [vmem:[#allocation5 + $0x20] sm:$0xff]  ;;  %v95_v49 = vld [vmem:[#allocation5 + $0x28] sm:$0xff] }
  0x25   :  { %174 = vmatpush.msra.mxu0 %v118_v24  ;;  %197 = vmatpush.msra.mxu1 %v119_v25  ;;  %v112_v50 = vld [vmem:[#allocation5 + $0xb0] sm:$0xff]  ;;  %v113_v51 = vld [vmem:[#allocation5 + $0xb8] sm:$0xff]  ;;  %v90_v52 = vld [vmem:[#allocation5] sm:$0xff] }
  0x26   :  { %242 = vmatpush.msra.mxu3 %v125_v39  ;;  %220 = vmatpush.msra.mxu2 %v120_v42  ;;  %v91_v53 = vld [vmem:[#allocation5 + $0x8] sm:$0xff]  ;;  %v88_v54 = vld [vmem:[#allocation2] sm:$0xff]  ;;  %v109_v56 = vld [vmem:[#allocation5 + $0x98] sm:$0xff] }
  0x27   :  { %175 = vmatpush.msra.mxu0 %v114_v28  ;;  %198 = vmatpush.msra.mxu1 %v115_v29  ;;  %v108_v55 = vld [vmem:[#allocation5 + $0x90] sm:$0xff]  ;;  %v105_v58 = vld [vmem:[#allocation5 + $0x78] sm:$0xff]  ;;  %v357_v6 = vld [vmem:[#allocation7 + $0x68] sm:$0xff] }
  0x28   :  { %243 = vmatpush.msra.mxu3 %v121_v43  ;;  %221 = vmatpush.msra.mxu2 %v116_v46  ;;  %v104_v57 = vld [vmem:[#allocation5 + $0x70] sm:$0xff]  ;;  %v101_v60 = vld [vmem:[#allocation5 + $0x58] sm:$0xff]  ;;  %v373_v7 = vld [vmem:[#allocation7 + $0xe8] sm:$0xff] }
  0x29   :  { %176 = vmatpush.msra.mxu0 %v110_v32  ;;  %199 = vmatpush.msra.mxu1 %v111_v33  ;;  %v100_v59 = vld [vmem:[#allocation5 + $0x50] sm:$0xff]  ;;  %v97_v62 = vld [vmem:[#allocation5 + $0x38] sm:$0xff]  ;;  %v356_v8 = vld [vmem:[#allocation7 + $0x60] sm:$0xff] }
  0x2a   :  { %244 = vmatpush.msra.mxu3 %v117_v47  ;;  %222 = vmatpush.msra.mxu2 %v112_v50  ;;  %v96_v61 = vld [vmem:[#allocation5 + $0x30] sm:$0xff]  ;;  %v89_v63 = vld [vmem:[#allocation2 + $0x8] sm:$0xff]  ;;  %v372_v9 = vld [vmem:[#allocation7 + $0xe0] sm:$0xff] }
  0x2b   :  { %177 = vmatpush.msra.mxu0 %v106_v36  ;;  %200 = vmatpush.msra.mxu1 %v107_v37  ;;  %v92_v0 = vld [vmem:[#allocation5 + $0x10] sm:$0xff]  ;;  %v93_v1 = vld [vmem:[#allocation5 + $0x18] sm:$0xff]  ;;  %v353_v14 = vld [vmem:[#allocation7 + $0x48] sm:$0xff] }
  0x2c   :  { %245 = vmatpush.msra.mxu3 %v113_v51  ;;  %223 = vmatpush.msra.mxu2 %v108_v55  ;;  %v359_v2 = vld [vmem:[#allocation7 + $0x78] sm:$0xff]  ;;  %v358_v4 = vld [vmem:[#allocation7 + $0x70] sm:$0xff]  ;;  %v369_v15 = vld [vmem:[#allocation7 + $0xc8] sm:$0xff] }
  0x2d   :  { %178 = vmatpush.msra.mxu0 %v102_v40  ;;  %201 = vmatpush.msra.mxu1 %v103_v41  ;;  %v375_v3 = vld [vmem:[#allocation7 + $0xf8] sm:$0xff]  ;;  %v374_v5 = vld [vmem:[#allocation7 + $0xf0] sm:$0xff]  ;;  %v352_v16 = vld [vmem:[#allocation7 + $0x40] sm:$0xff] }
  0x2e   :  { %246 = vmatpush.msra.mxu3 %v109_v56  ;;  %224 = vmatpush.msra.mxu2 %v104_v57  ;;  %v355_v10 = vld [vmem:[#allocation7 + $0x58] sm:$0xff]  ;;  %v354_v12 = vld [vmem:[#allocation7 + $0x50] sm:$0xff]  ;;  %v368_v17 = vld [vmem:[#allocation7 + $0xc0] sm:$0xff] }
  0x2f   :  { %179 = vmatpush.msra.mxu0 %v98_v44  ;;  %202 = vmatpush.msra.mxu1 %v99_v45  ;;  %v371_v11 = vld [vmem:[#allocation7 + $0xd8] sm:$0xff]  ;;  %v370_v13 = vld [vmem:[#allocation7 + $0xd0] sm:$0xff]  ;;  %v708_v22 = vld [vmem:[#allocation8] sm:$0xf] }
  0x30   :  { %247 = vmatpush.msra.mxu3 %v105_v58  ;;  %225 = vmatpush.msra.mxu2 %v100_v59  ;;  %v351_v18 = vld [vmem:[#allocation7 + $0x38] sm:$0xff]  ;;  %v350_v20 = vld [vmem:[#allocation7 + $0x30] sm:$0xff]  ;;  %v349_v23 = vld [vmem:[#allocation7 + $0x28] sm:$0xff]  ;;  %v158_v25 = vperm.slane %v708_v22, 0  ;;  %v159_v26 = vperm.slane %v708_v22, 1 }
  0x31   :  { %180 = vmatpush.msra.mxu0 %v94_v48  ;;  %203 = vmatpush.msra.mxu1 %v95_v49  ;;  %v367_v19 = vld [vmem:[#allocation7 + $0xb8] sm:$0xff]  ;;  %v366_v21 = vld [vmem:[#allocation7 + $0xb0] sm:$0xff]  ;;  %v365_v24 = vld [vmem:[#allocation7 + $0xa8] sm:$0xff] }
  0x32   :  { %248 = vmatpush.msra.mxu3 %v101_v60  ;;  %226 = vmatpush.msra.mxu2 %v96_v61  ;;  %v348_v27 = vld [vmem:[#allocation7 + $0x20] sm:$0xff]  ;;  %v347_v29 = vld [vmem:[#allocation7 + $0x18] sm:$0xff]  ;;  %v346_v35 = vld [vmem:[#allocation7 + $0x10] sm:$0xff] }
  0x33   :  { %181 = vmatpush.msra.mxu0 %v90_v52  ;;  %204 = vmatpush.msra.mxu1 %v91_v53  ;;  %v364_v28 = vld [vmem:[#allocation7 + $0xa0] sm:$0xff]  ;;  %v363_v30 = vld [vmem:[#allocation7 + $0x98] sm:$0xff]  ;;  %v362_v36 = vld [vmem:[#allocation7 + $0x90] sm:$0xff] }
  0x34   :  { %182 = vmatmul.f32.vlgmr.msra.gmra.mxu0 %v88_v54  ;;  %205 = vmatmul.f32.vlgmr.msra.gmra.mxu1 %v88_v54  ;;  %v345_v39 = vld [vmem:[#allocation7 + $0x8] sm:$0xff]  ;;  %v344_v41 = vld [vmem:[#allocation7] sm:$0xff] }
  0x35   :  { %249 = vmatpush.msra.mxu3 %v97_v62  ;;  %227 = vmatpush.msra.mxu2 %v92_v0  ;;  %v361_v40 = vld [vmem:[#allocation7 + $0x88] sm:$0xff]  ;;  %v360_v42 = vld [vmem:[#allocation7 + $0x80] sm:$0xff] }
  0x36   :  { %228 = vmatmul.f32.vlgmr.msra.gmra.mxu2 %v88_v54  ;;  %376 = vmatpush.msrb.mxu0 %v359_v2 }
  0x37   :  { %250 = vmatpush.msra.mxu3 %v93_v1  ;;  %399 = vmatpush.msrb.mxu1 %v375_v3  ;;  %v160_v1 = vperm.slane %v708_v22, 2 }
  0x38   :  { %251 = vmatmul.f32.vlgmr.msra.gmra.mxu3 %v88_v54  ;;  %464 = vmatpush.msrb.mxu2 %v359_v2 }
  0x39   :  { %480 = vmatpush.msrb.mxu3 %v375_v3  ;;  %377 = vmatpush.msrb.mxu0 %v358_v4 }
  0x3a   :  { %400 = vmatpush.msrb.mxu1 %v374_v5  ;;  %465 = vmatpush.msrb.mxu2 %v358_v4 }
  0x3b   :  { %481 = vmatpush.msrb.mxu3 %v374_v5  ;;  %378 = vmatpush.msrb.mxu0 %v357_v6 }
  0x3c   :  { %185 = vmatmul.f32.gmra.mxu0 %v89_v63  ;;  %208 = vmatmul.f32.gmra.mxu1 %v89_v63 }
  0x3d   :  { %401 = vmatpush.msrb.mxu1 %v373_v7  ;;  %466 = vmatpush.msrb.mxu2 %v357_v6 }
  0x3e   :  { %231 = vmatmul.f32.gmra.mxu2 %v89_v63  ;;  %482 = vmatpush.msrb.mxu3 %v373_v7  ;;  %v161_v7 = vperm.slane %v708_v22, 3 }
  0x3f   :  { %379 = vmatpush.msrb.mxu0 %v356_v8  ;;  %402 = vmatpush.msrb.mxu1 %v372_v9 }
  0x40   :  { %254 = vmatmul.f32.gmra.mxu3 %v89_v63  ;;  %467 = vmatpush.msrb.mxu2 %v356_v8 }
  0x41   :  { %483 = vmatpush.msrb.mxu3 %v372_v9  ;;  %380 = vmatpush.msrb.mxu0 %v355_v10 }
  0x42   :  { %403 = vmatpush.msrb.mxu1 %v371_v11  ;;  %468 = vmatpush.msrb.mxu2 %v355_v10 }
  0x43   :  { %484 = vmatpush.msrb.mxu3 %v371_v11  ;;  %381 = vmatpush.msrb.mxu0 %v354_v12 }
  0x44   :  { %404 = vmatpush.msrb.mxu1 %v370_v13  ;;  %469 = vmatpush.msrb.mxu2 %v354_v12 }
  0x45   :  { %485 = vmatpush.msrb.mxu3 %v370_v13  ;;  %382 = vmatpush.msrb.mxu0 %v353_v14 }
  0x46   :  { %405 = vmatpush.msrb.mxu1 %v369_v15  ;;  %470 = vmatpush.msrb.mxu2 %v353_v14 }
  0x47   :  { %486 = vmatpush.msrb.mxu3 %v369_v15  ;;  %383 = vmatpush.msrb.mxu0 %v352_v16 }
  0x48   :  { %406 = vmatpush.msrb.mxu1 %v368_v17  ;;  %471 = vmatpush.msrb.mxu2 %v352_v16 }
  0x49   :  { %487 = vmatpush.msrb.mxu3 %v368_v17  ;;  %384 = vmatpush.msrb.mxu0 %v351_v18 }
  0x4a   :  { %407 = vmatpush.msrb.mxu1 %v367_v19  ;;  %472 = vmatpush.msrb.mxu2 %v351_v18 }
  0x4b   :  { %488 = vmatpush.msrb.mxu3 %v367_v19  ;;  %385 = vmatpush.msrb.mxu0 %v350_v20 }
  0x4c   :  { %408 = vmatpush.msrb.mxu1 %v366_v21  ;;  %473 = vmatpush.msrb.mxu2 %v350_v20 }
  0x4d   :  { %489 = vmatpush.msrb.mxu3 %v366_v21  ;;  %386 = vmatpush.msrb.mxu0 %v349_v23 }
  0x4e   :  { %409 = vmatpush.msrb.mxu1 %v365_v24  ;;  %474 = vmatpush.msrb.mxu2 %v349_v23 }
  0x4f   :  { %490 = vmatpush.msrb.mxu3 %v365_v24  ;;  %387 = vmatpush.msrb.mxu0 %v348_v27 }
  0x50   :  { %410 = vmatpush.msrb.mxu1 %v364_v28  ;;  %475 = vmatpush.msrb.mxu2 %v348_v27 }
  0x51   :  { %491 = vmatpush.msrb.mxu3 %v364_v28  ;;  %388 = vmatpush.msrb.mxu0 %v347_v29 }
  0x52   :  { %411 = vmatpush.msrb.mxu1 %v363_v30  ;;  %476 = vmatpush.msrb.mxu2 %v347_v29 }
  0x53   :  { %492 = vmatpush.msrb.mxu3 %v363_v30  ;;  %389 = vmatpush.msrb.mxu0 %v346_v35 }
  0x54   :  { %412 = vmatpush.msrb.mxu1 %v362_v36  ;;  %477 = vmatpush.msrb.mxu2 %v346_v35 }
  0x55   :  { %493 = vmatpush.msrb.mxu3 %v362_v36  ;;  %390 = vmatpush.msrb.mxu0 %v345_v39 }
  0x56   :  { %413 = vmatpush.msrb.mxu1 %v361_v40  ;;  %478 = vmatpush.msrb.mxu2 %v345_v39 }
  0x57   :  { %494 = vmatpush.msrb.mxu3 %v361_v40  ;;  %391 = vmatpush.msrb.mxu0 %v344_v41 }
  0x58   :  { %414 = vmatpush.msrb.mxu1 %v360_v42  ;;  %479 = vmatpush.msrb.mxu2 %v344_v41 }
  0x59   :  { %495 = vmatpush.msrb.mxu3 %v360_v42 }
  0xb1   :  { %v183_v31 = vpop.f32.mrf.mxu0  ;;  %v206_v32 = vpop.f32.mrf.mxu1 }
  0xb2   :  { %v712_v33 = vadd.f32 %v183_v31, %v158_v25  ;;  %v714_v34 = vadd.f32 %v206_v32, %v159_v26 }
  0xb4   :  { %v460_v37 = vmul.f32 -1.442695, %v712_v33  ;;  %v461_v38 = vmul.f32 -1.442695, %v714_v34 }
  0xb6   :  { %507 = vpow2.f32 %v460_v37 }
  0xb7   :  { %509 = vpow2.f32 %v461_v38 }
  0xb9   :  { %v186_v43 = vpop.f32.mrf.mxu0  ;;  %v209_v44 = vpop.f32.mrf.mxu1 }
  0xba   :  { %v718_v45 = vadd.f32 %v186_v43, %v158_v25  ;;  %v720_v46 = vadd.f32 %v209_v44, %v159_v26  ;;  %v229_v2 = vpop.f32.mrf.mxu2 }
  0xbb   :  { %v252_v9 = vpop.f32.mrf.mxu3  ;;  %v230_v16 = vadd.f32 %v229_v2, %v160_v1 }
  0xbc   :  { %v508_v47 = vpop.eup %507  ;;  %v462_v48 = vmul.f32 -1.442695, %v718_v45  ;;  %v463_v51 = vmul.f32 -1.442695, %v720_v46  ;;  %v253_v19 = vadd.f32 %v252_v9, %v161_v7 }
  0xbd   :  { %v510_v49 = vpop.eup %509  ;;  %v270_v50 = vadd.f32 1.0, %v508_v47 }
  0xbe   :  { %v271_v52 = vadd.f32 1.0, %v510_v49  ;;  %511 = vpow2.f32 %v462_v48 }
  0xbf   :  { %513 = vrcp.f32 %v270_v50  ;;  %v283_v62 = vand.u32 2147483647, %v270_v50  ;;  %v285_v63 = vand.u32 2147483648, %v270_v50  ;;  %vm279_vm2 = vweird.f32 %v270_v50 }
  0xc0   :  { %515 = vrcp.f32 %v271_v52  ;;  %v300_v4 = vand.u32 2147483648, %v271_v52  ;;  %v298_v6 = vand.u32 2147483647, %v271_v52  ;;  %vm294_vm5 = vweird.f32 %v271_v52 }
  0xc1   :  { %517 = vpow2.f32 %v463_v51  ;;  %vm284_vm4 = vcmp.eq.f32.partialorder %v283_v62, 8.507059e+37  ;;  %v286_v11 = vor.u32 1.1754944e-38, %v285_v63 }
  0xc2   :  { %v301_v14 = vor.u32 1.1754944e-38, %v300_v4  ;;  %vm299_vm7 = vcmp.eq.f32.partialorder %v298_v6, 8.507059e+37  ;;  %v232_v32 = vpop.f32.mrf.mxu2 }
  0xc3   :  { %v233_v39 = vadd.f32 %v232_v32, %v160_v1  ;;  %v255_v40 = vpop.f32.mrf.mxu3 }
  0xc4   :  { %v512_v53 = vpop.eup %511  ;;  %v256_v48 = vadd.f32 %v255_v40, %v161_v7 }
  0xc5   :  { %v514_v54 = vpop.eup %513  ;;  %v724_v55 = vadd.f32 1.0, %v512_v53 }
  0xc6   :  { %v516_v56 = vpop.eup %515  ;;  %v275_v57 = vmul.f32 %v514_v54, %v270_v50  ;;  %vm280_vm0 = vweird.f32 %v514_v54 }
  0xc7   :  { %v518_v58 = vpop.eup %517  ;;  %v290_v59 = vmul.f32 %v516_v56, %v271_v52  ;;  %519 = vrcp.f32 %v724_v55  ;;  %vm295_vm1 = vweird.f32 %v516_v56  ;;  %vm281_vm3 = vmor %vm279_vm2, %vm280_vm0  ;;  %v315_v25 = vand.u32 2147483648, %v724_v55 }
  0xc8   :  { %v276_v60 = vsub.f32 1.0, %v275_v57  ;;  %v727_v61 = vadd.f32 1.0, %v518_v58  ;;  %vm296_vm6 = vmor %vm294_vm5, %vm295_vm1  ;;  %v313_v28 = vand.u32 2147483647, %v724_v55  ;;  %vm309_vm9 = vweird.f32 %v724_v55 }
  0xc9   :  { %v291_v0 = vsub.f32 1.0, %v290_v59 }
  0xca   :  { %v277_v3 = vmul.f32 %v514_v54, %v276_v60  ;;  %521 = vrcp.f32 %v727_v61  ;;  %v328_v37 = vand.u32 2147483647, %v727_v61  ;;  %vm314_vm12 = vcmp.eq.f32.partialorder %v313_v28, 8.507059e+37 }
  0xcb   :  { %v292_v5 = vmul.f32 %v516_v56, %v291_v0  ;;  %vm324_vm13 = vweird.f32 %v727_v61 }
  0xcc   :  { %v278_v8 = vadd.f32 %v514_v54, %v277_v3  ;;  %vm329_vm15 = vcmp.eq.f32.partialorder %v328_v37, 8.507059e+37 }
  0xcd   :  { %v520_v10 = vpop.eup %519  ;;  %v293_v12 = vadd.f32 %v516_v56, %v292_v5 }
  0xce   :  { %v282_v13 = vsel %vm281_vm3, %v514_v54, %v278_v8  ;;  %v305_v15 = vmul.f32 %v520_v10, %v724_v55  ;;  %vm310_vm8 = vweird.f32 %v520_v10 }
  0xcf   :  { %v287_v17 = vsel %vm284_vm4, %v286_v11, %v282_v13  ;;  %v297_v18 = vsel %vm296_vm6, %v516_v56, %v293_v12  ;;  %vm311_vm10 = vmor %vm309_vm9, %vm310_vm8  ;;  %v506_v56 = vld [vmem:[%s757_s4] ss:$0 sm:$0xff] }
  0xd0   :  { %v522_v20 = vpop.eup %521  ;;  %v334_v21 = vmul.f32 %v287_v17, %v712_v33  ;;  %v302_v22 = vsel %vm299_vm7, %v301_v14, %v297_v18  ;;  %v306_v23 = vsub.f32 1.0, %v305_v15  ;;  %v330_v33 = vand.u32 2147483648, %v727_v61 }
  0xd1   :  { %v335_v24 = vmul.f32 %v302_v22, %v714_v34  ;;  %v320_v26 = vmul.f32 %v522_v20, %v727_v61  ;;  %v316_v34 = vor.u32 1.1754944e-38, %v315_v25  ;;  %vm325_vm11 = vweird.f32 %v522_v20 }
  0xd2   :  { %v307_v27 = vmul.f32 %v520_v10, %v306_v23  ;;  %v338_v29 = vmul.f32 %v334_v21, %v230_v16  ;;  %vm326_vm14 = vmor %vm324_vm13, %vm325_vm11  ;;  %v331_v44 = vor.u32 1.1754944e-38, %v330_v33 }
  0xd3   :  { %v321_v30 = vsub.f32 1.0, %v320_v26  ;;  %v339_v31 = vmul.f32 %v335_v24, %v253_v19 }
  0xd4   :  { %v308_v35 = vadd.f32 %v520_v10, %v307_v27  ;;  %392 = vmatmul.f32.vlgmr.msrb.gmra.mxu0 %v338_v29 }
  0xd5   :  { %v322_v36 = vmul.f32 %v522_v20, %v321_v30  ;;  %415 = vmatmul.f32.vlgmr.msrb.gmra.mxu1 %v339_v31 }
  0xd6   :  { %v312_v38 = vsel %vm311_vm10, %v520_v10, %v308_v35 }
  0xd7   :  { %v317_v41 = vsel %vm314_vm12, %v316_v34, %v312_v38  ;;  %v323_v42 = vadd.f32 %v522_v20, %v322_v36 }
  0xd8   :  { %v336_v43 = vmul.f32 %v317_v41, %v718_v45 }
  0xd9   :  { %v327_v47 = vsel %vm326_vm14, %v522_v20, %v323_v42 }
  0xda   :  { %v332_v49 = vsel %vm329_vm15, %v331_v44, %v327_v47  ;;  %v340_v50 = vmul.f32 %v336_v43, %v233_v39 }
  0xdb   :  { %v337_v51 = vmul.f32 %v332_v49, %v720_v46 }
  0xdc   :  { %395 = vmatmul.f32.vlgmr.msrb.gmra.mxu2 %v340_v50 }
  0xdd   :  { %v341_v52 = vmul.f32 %v337_v51, %v256_v48 }
  0xdf   :  { %418 = vmatmul.f32.vlgmr.msrb.gmra.mxu3 %v341_v52 }
 0x151   :  { %v393_v53 = vpop.f32.mrf.mxu0 }
 0x152   :  { %v416_v54 = vpop.f32.mrf.mxu1 }
 0x153   :  { %v417_v55 = vadd.f32 %v416_v54, %v393_v53 }
 0x155   :  { %v435_v45 = vadd.f32 %v506_v56, %v417_v55 }
 0x157   :  { %437 = vst [vmem:[#allocation10] sm:$0xff] %v435_v45 }
 0x15f   :  { %v396_v57 = vpop.f32.mrf.mxu2 }
 0x162   :  { %v419_v58 = vpop.f32.mrf.mxu3 }
 0x163   :  { %v420_v59 = vadd.f32 %v419_v58, %v396_v57 }
 0x165   :  { %v436_v46 = vadd.f32 %v506_v56, %v420_v59 }
 0x167   :  { %438 = vst [vmem:[#allocation10 + $0x8] sm:$0xff] %v436_v46 }
 0x168   :  { %451 = dma.vmem_to_hbm [thread:$0]  %s444_s16, 256, %s446_s19, [#allocation4], %s655_s30, %s655_s30, %s656_s6  }
 0x169   :  { %649 = dma.done.wait [#allocation4], 256  }
 0x16a   :  { %650 = vsyncadd [#allocation4], 4294967040 }
 0x16b   :  { %456 = vsyncpa [#allocation3], 1 }
 0x16c   :  { %457 = vsyncpa [#allocation6], 1 }
 0x16d   :  { %458 = vsyncpa [#allocation9], 1 }
 0x16e   :  { %459 = vsyncpa [#allocation4], 1 }

</bundles_post_ra>
